<compile_context>
chip_gen: v7x
topology: tpu7x:2x2x1
jax: 0.10.0
libtpu: 0.0.40
codegen_flags: <defaults>
</compile_context>

<pallas_src>
import functools

import jax
import jax.numpy as jnp
from jax.experimental import pallas as pl
from jax.experimental.pallas import tpu as pltpu


def cnn_kernel(emb_ref, wconv_ref, bconv_ref, wout_ref, bout_ref, o_ref):
    # emb_ref:   (TB, L, E)   un-padded embeddings for TB batch elements
    # wconv_ref: (3*E, C)     im2col conv weight (tap k occupies rows k*E:(k+1)*E)
    # bconv_ref: (1, C)       f32
    # wout_ref:  (C, O_pad)   f32, output dim zero-padded to a lane multiple
    # bout_ref:  (1, O_pad)   f32
    # o_ref:     (TB, O_pad)  f32
    e = emb_ref[...]
    TB, L, E = e.shape

    # Conv2d(1, C, (3, E), padding=(1, 0)): pad one zero row on each side of L
    # inside VMEM, then im2col the three taps into one MXU matmul with K=3E.
    zrow = jnp.zeros((TB, 1, E), e.dtype)
    e_pad = jnp.concatenate([zrow, e, zrow], axis=1)                 # (TB, L+2, E)
    win = jnp.concatenate(
        [e_pad[:, 0:L, :], e_pad[:, 1:L + 1, :], e_pad[:, 2:L + 2, :]],
        axis=-1)                                                     # (TB, L, 3E)
    conv = jnp.dot(win.reshape(TB * L, 3 * E), wconv_ref[...],
                   preferred_element_type=jnp.float32)               # (TB*L, C)
    conv = conv + bconv_ref[...]                                     # f32 bias

    # ReLU + global max-pool over the sequence dimension (f32 on VPU/XLU).
    act = jnp.maximum(conv, 0.0).reshape(TB, L, conv.shape[-1])
    pooled = jnp.max(act, axis=1)                                    # (TB, C)

    # Dropout(0.1) is identity in eval mode.
    # Final Linear for all TB rows at once; O padded to 128 lanes so the
    # output store is unmasked / lane-dense.
    out = jnp.dot(pooled, wout_ref[...],
                  preferred_element_type=jnp.float32) + bout_ref[...]
    o_ref[...] = out.astype(o_ref.dtype)


@functools.partial(jax.jit, static_argnames=("block_b", "use_bf16"))
def cnn_forward(x, emb_table, wconv, bconv, wout, bout, *,
                block_b=None, use_bf16=True):
    B, L = x.shape
    E = emb_table.shape[1]
    C = wconv.shape[2]
    O = wout.shape[1]

    # Batch tile: aim for >=128-256 rows feeding the MXU per grid step.
    # (On v7x with large B one would additionally prefer an even number of grid
    #  steps to keep both TensorCores busy.)
    if block_b is None:
        block_b = min(B, max(1, 256 // L))
    num_blocks = pl.cdiv(B, block_b)
    B_pad = num_blocks * block_b

    # Lane-dense output: pad the output feature dim up to a multiple of 128.
    O_pad = 128 * pl.cdiv(O, 128)

    compute_dtype = jnp.bfloat16 if use_bf16 else jnp.float32

    x_pad = x if B_pad == B else jnp.pad(x, ((0, B_pad - B), (0, 0)))

    # Embedding lookup (gather) stays in XLA; NO sequence padding in HBM --
    # the conv's height padding is handled inside the kernel.
    emb = jnp.take(emb_table.astype(compute_dtype), x_pad, axis=0)   # (B_pad, L, E)

    wconv2 = wconv.reshape(3 * E, C).astype(compute_dtype)           # im2col layout
    bconv2 = bconv.reshape(1, C).astype(jnp.float32)
    wout_p = jnp.pad(wout.astype(jnp.float32), ((0, 0), (0, O_pad - O)))
    bout_p = jnp.pad(bout.astype(jnp.float32), ((0, O_pad - O),)).reshape(1, O_pad)

    out = pl.pallas_call(
        cnn_kernel,
        out_shape=jax.ShapeDtypeStruct((B_pad, O_pad), jnp.float32),
        grid_spec=pltpu.PrefetchScalarGridSpec(
            num_scalar_prefetch=0,
            grid=(num_blocks,),
            in_specs=[
                pl.BlockSpec((block_b, L, E), lambda b: (b, 0, 0)),
                # Weights / biases are grid-invariant (constant index_map).
                pl.BlockSpec((3 * E, C), lambda b: (0, 0)),
                pl.BlockSpec((1, C), lambda b: (0, 0)),
                pl.BlockSpec((C, O_pad), lambda b: (0, 0)),
                pl.BlockSpec((1, O_pad), lambda b: (0, 0)),
            ],
            out_specs=pl.BlockSpec((block_b, O_pad), lambda b: (b, 0)),
        ),
        compiler_params=pltpu.CompilerParams(
            dimension_semantics=("parallel",)),
    )(emb, wconv2, bconv2, wout_p, bout_p)
    return out[:B, :O]


def reference_forward(x, emb_table, wconv, bconv, wout, bout):
    # Pure-JAX f32 reference reproducing the PyTorch forward.
    emb = jnp.take(emb_table, x, axis=0)                             # (B, L, E)
    emb_pad = jnp.pad(emb, ((0, 0), (1, 1), (0, 0)))                 # (B, L+2, E)
    B, L, E = emb.shape
    C = wconv.shape[2]
    conv = jnp.zeros((B, L, C), jnp.float32)
    for k in range(3):
        conv = conv + jnp.einsum('ble,ec->blc',
                                 emb_pad[:, k:k + L, :], wconv[k],
                                 preferred_element_type=jnp.float32)
    conv = conv + bconv[None, None, :]
    act = jnp.maximum(conv, 0.0)
    pooled = jnp.max(act, axis=1)                                    # (B, C)
    return pooled @ wout + bout[None, :]


if __name__ == "__main__":
    # Small shapes consistent with the module.
    vocab_size = 16
    emb_size = 32        # E
    padding_idx = 0
    output_size = 4      # O
    out_channels = 8     # C
    B, L = 2, 8

    key = jax.random.PRNGKey(0)
    k_emb, k_wc, k_bc, k_wo, k_bo, k_x = jax.random.split(key, 6)

    # Deterministic parameter init (synthetic; no checkpoint load).
    emb_table = jax.random.normal(k_emb, (vocab_size, emb_size), jnp.float32)
    emb_table = emb_table.at[padding_idx].set(0.0)     # padding_idx row = 0

    # Conv2d weight in PyTorch is (C, 1, 3, E); stored as (3, E, C).
    wconv = 0.1 * jax.random.normal(k_wc, (3, emb_size, out_channels), jnp.float32)
    bconv = 0.1 * jax.random.normal(k_bc, (out_channels,), jnp.float32)

    # Linear weight (PyTorch (O, C)) stored transposed as (C, O).
    wout = 0.1 * jax.random.normal(k_wo, (out_channels, output_size), jnp.float32)
    bout = 0.1 * jax.random.normal(k_bo, (output_size,), jnp.float32)

    x = jax.random.randint(k_x, (B, L), 0, vocab_size, jnp.int32)

    ref_f32 = reference_forward(x, emb_table, wconv, bconv, wout, bout)

    # 1) f32 kernel: tight check against the f32 reference (exact semantics).
    out_f32 = jax.block_until_ready(
        cnn_forward(x, emb_table, wconv, bconv, wout, bout, use_bf16=False))
    assert out_f32.shape == (B, output_size)
    assert jnp.allclose(out_f32, ref_f32, atol=1e-4, rtol=1e-4), (out_f32, ref_f32)

    # 2) bf16-input kernel (perf default for v6e/v7x MXU): tight check against a
    #    reference fed the same bf16-rounded inputs, loose check against f32.
    out_bf16 = jax.block_until_ready(
        cnn_forward(x, emb_table, wconv, bconv, wout, bout, use_bf16=True))
    emb_r = emb_table.astype(jnp.bfloat16).astype(jnp.float32)
    wconv_r = wconv.astype(jnp.bfloat16).astype(jnp.float32)
    ref_bf16 = reference_forward(x, emb_r, wconv_r, bconv, wout, bout)
    assert out_bf16.shape == (B, output_size)
    assert jnp.allclose(out_bf16, ref_bf16, atol=2e-3, rtol=2e-3), (out_bf16, ref_bf16)
    assert jnp.allclose(out_bf16, ref_f32, atol=1e-1, rtol=1e-1), (out_bf16, ref_f32)

    print("KERNEL_OK")
</pallas_src>

<mosaic_0001>
module attributes {stable_mosaic.version = 11 : i64} {
  func.func @cnn_kernel(%arg0: i32, %arg1: memref<2x8x32xf32, #tpu.memory_space<vmem>>, %arg2: memref<96x8xf32, #tpu.memory_space<vmem>>, %arg3: memref<1x8xf32, #tpu.memory_space<vmem>>, %arg4: memref<8x128xf32, #tpu.memory_space<vmem>>, %arg5: memref<1x128xf32, #tpu.memory_space<vmem>>, %arg6: memref<2x128xf32, #tpu.memory_space<vmem>>) attributes {dimension_semantics = [#tpu.dimension_semantics<parallel>], iteration_bounds = array<i64: 1>, scalar_prefetch = 0 : i64, scratch_operands = 0 : i64, tpu.core_type = #tpu.core_type<tc>, window_params = [{transform_indices = @transform_0, window_bounds = array<i64: 2, 8, 32>}, {pipeline_mode = #tpu.pipeline_mode<synchronous>, transform_indices = @transform_1, window_bounds = array<i64: 96, 8>}, {pipeline_mode = #tpu.pipeline_mode<synchronous>, transform_indices = @transform_2, window_bounds = array<i64: 1, 8>}, {pipeline_mode = #tpu.pipeline_mode<synchronous>, transform_indices = @transform_3, window_bounds = array<i64: 8, 128>}, {pipeline_mode = #tpu.pipeline_mode<synchronous>, transform_indices = @transform_4, window_bounds = array<i64: 1, 128>}, {transform_indices = @transform_5, window_bounds = array<i64: 2, 128>}]} {
    %c0 = arith.constant 0 : index
    %c0_0 = arith.constant 0 : index
    %c0_1 = arith.constant 0 : index
    %0 = vector.load %arg1[%c0, %c0_0, %c0_1] : memref<2x8x32xf32, #tpu.memory_space<vmem>>, vector<2x8x32xf32>
    %cst = arith.constant 0.000000e+00 : f32
    %1 = vector.broadcast %cst : f32 to vector<2x1x32xf32>
    %2 = tpu.concatenate %1, %0, %1 in 1 : vector<2x1x32xf32>, vector<2x8x32xf32>, vector<2x1x32xf32> -> vector<2x10x32xf32>
    %3 = vector.extract_strided_slice %2 {offsets = [0, 0, 0], sizes = [2, 8, 32], strides = [1, 1, 1]} : vector<2x10x32xf32> to vector<2x8x32xf32>
    %4 = vector.extract_strided_slice %2 {offsets = [0, 1, 0], sizes = [2, 8, 32], strides = [1, 1, 1]} : vector<2x10x32xf32> to vector<2x8x32xf32>
    %5 = vector.extract_strided_slice %2 {offsets = [0, 2, 0], sizes = [2, 8, 32], strides = [1, 1, 1]} : vector<2x10x32xf32> to vector<2x8x32xf32>
    %6 = tpu.concatenate %3, %4, %5 in 2 : vector<2x8x32xf32>, vector<2x8x32xf32>, vector<2x8x32xf32> -> vector<2x8x96xf32>
    %7 = vector.shape_cast %6 : vector<2x8x96xf32> to vector<16x96xf32>
    %c0_2 = arith.constant 0 : index
    %c0_3 = arith.constant 0 : index
    %8 = vector.load %arg2[%c0_2, %c0_3] : memref<96x8xf32, #tpu.memory_space<vmem>>, vector<96x8xf32>
    %cst_4 = arith.constant dense<0.000000e+00> : vector<16x8xf32>
    %9 = tpu.matmul %7, %8, %cst_4 {dimension_numbers = #tpu.dot_dimension_numbers<[1], [0], [0], [1], [0, 0, 1, 1], [], []>} : vector<16x96xf32>, vector<96x8xf32>, vector<16x8xf32> -> vector<16x8xf32>
    %c0_5 = arith.constant 0 : index
    %c0_6 = arith.constant 0 : index
    %10 = vector.load %arg3[%c0_5, %c0_6] : memref<1x8xf32, #tpu.memory_space<vmem>>, vector<1x8xf32>
    %11 = vector.broadcast %10 : vector<1x8xf32> to vector<16x8xf32>
    %12 = arith.addf %9, %11 : vector<16x8xf32>
    %cst_7 = arith.constant 0.000000e+00 : f32
    %13 = vector.broadcast %cst_7 : f32 to vector<16x8xf32>
    %14 = arith.maximumf %12, %13 : vector<16x8xf32>
    %15 = vector.shape_cast %14 : vector<16x8xf32> to vector<2x8x8xf32>
    %cst_8 = arith.constant dense<0xFF800000> : vector<2x8xf32>
    %16 = vector.multi_reduction <maximumf>, %15, %cst_8 [1] : vector<2x8x8xf32> to vector<2x8xf32>
    %c0_9 = arith.constant 0 : index
    %c0_10 = arith.constant 0 : index
    %17 = vector.load %arg4[%c0_9, %c0_10] : memref<8x128xf32, #tpu.memory_space<vmem>>, vector<8x128xf32>
    %cst_11 = arith.constant dense<0.000000e+00> : vector<2x128xf32>
    %18 = tpu.matmul %16, %17, %cst_11 {dimension_numbers = #tpu.dot_dimension_numbers<[1], [0], [0], [1], [0, 0, 1, 1], [], []>} : vector<2x8xf32>, vector<8x128xf32>, vector<2x128xf32> -> vector<2x128xf32>
    %c0_12 = arith.constant 0 : index
    %c0_13 = arith.constant 0 : index
    %19 = vector.load %arg5[%c0_12, %c0_13] : memref<1x128xf32, #tpu.memory_space<vmem>>, vector<1x128xf32>
    %20 = vector.broadcast %19 : vector<1x128xf32> to vector<2x128xf32>
    %21 = arith.addf %18, %20 : vector<2x128xf32>
    %c0_14 = arith.constant 0 : index
    %c0_15 = arith.constant 0 : index
    %22 = vector.load %arg6[%c0_14, %c0_15] : memref<2x128xf32, #tpu.memory_space<vmem>>, vector<2x128xf32>
    tpu.vector_store %arg6[%c0_14, %c0_15], %21 {strides = array<i32>} : memref<2x128xf32, #tpu.memory_space<vmem>>, vector<2x128xf32>,
    return
  }
  func.func @transform_0(%arg0: i32) -> (i32, i32, i32) {
    %c0_i32 = arith.constant 0 : i32
    %c0_i32_0 = arith.constant 0 : i32
    %c0_i32_1 = arith.constant 0 : i32
    return %arg0, %c0_i32, %c0_i32_0 : i32, i32, i32
  }
  func.func @transform_1(%arg0: i32) -> (i32, i32) {
    %c0_i32 = arith.constant 0 : i32
    %c0_i32_0 = arith.constant 0 : i32
    %c0_i32_1 = arith.constant 0 : i32
    return %c0_i32, %c0_i32_0 : i32, i32
  }
  func.func @transform_2(%arg0: i32) -> (i32, i32) {
    %c0_i32 = arith.constant 0 : i32
    %c0_i32_0 = arith.constant 0 : i32
    %c0_i32_1 = arith.constant 0 : i32
    return %c0_i32, %c0_i32_0 : i32, i32
  }
  func.func @transform_3(%arg0: i32) -> (i32, i32) {
    %c0_i32 = arith.constant 0 : i32
    %c0_i32_0 = arith.constant 0 : i32
    %c0_i32_1 = arith.constant 0 : i32
    return %c0_i32, %c0_i32_0 : i32, i32
  }
  func.func @transform_4(%arg0: i32) -> (i32, i32) {
    %c0_i32 = arith.constant 0 : i32
    %c0_i32_0 = arith.constant 0 : i32
    %c0_i32_1 = arith.constant 0 : i32
    return %c0_i32, %c0_i32_0 : i32, i32
  }
  func.func @transform_5(%arg0: i32) -> (i32, i32) {
    %c0_i32 = arith.constant 0 : i32
    %c0_i32_0 = arith.constant 0 : i32
    return %arg0, %c0_i32 : i32, i32
  }
}

</mosaic_0001>

<bundles_post_ra>
// kernel: cnn_forward.1
= control target key start
LH: loop header
LB: loop body
LE: loop exit
PB: predicated region body
PF: predicated region fallthrough
CT: control target
= control target key end

     0   :  { %vm29_vm0 = vcmask 1040384   ;;  %vm38_vm1 = vcmask 1046528   ;;  %vm51_vm2 = vcmask 1045504   ;;  %s502_s0 = inlined_call_operand.vmem [shape: f32[2,8,32], index: 0, kind: input, shape index: {}]   ;;  %s503_s1 = inlined_call_operand.vmem [shape: f32[96,8], index: 1, kind: input, shape index: {}]   ;;  %s504_s2 = inlined_call_operand.vmem [shape: f32[1,8], index: 2, kind: input, shape index: {}]   ;;  %s505_s3 = inlined_call_operand.vmem [shape: f32[8,128], index: 3, kind: input, shape index: {}]   ;;  %s506_s4 = inlined_call_operand.vmem [shape: f32[1,128], index: 4, kind: input, shape index: {}]   ;;  %s507_s5 = inlined_call_operand.hbm [shape: f32[2,128], index: 5, kind: output, shape index: {}]  }
   0x1   :  { %v21_v0 = vld [vmem:[%s502_s0] sm:$0xff]  ;;  %v22_v2 = vld [vmem:[%s502_s0 + $0x8] sm:$0xff]  ;;  %v72_v7 = vld [vmem:[%s503_s1 + $0x10] sm:$0xff] }
   0x2   :  { %v25_v1 = vrot.slane %v21_v0, 7  ;;  %v70_v3 = vld [vmem:[%s503_s1] sm:$0xff]  ;;  %v71_v4 = vld [vmem:[%s503_s1 + $0x8] sm:$0xff]  ;;  %v26_v5 = vrot.slane %v22_v2, 7  ;;  %v73_v8 = vld [vmem:[%s503_s1 + $0x18] sm:$0xff] }
   0x3   :  { %v340_v6 = vpack.c.bf16 %v71_v4, %v70_v3  ;;  %v74_v9 = vld [vmem:[%s503_s1 + $0x20] sm:$0xff]  ;;  %v344_v12 = vpack.c.bf16 %v73_v8, %v72_v7  ;;  %v75_v13 = vld [vmem:[%s503_s1 + $0x28] sm:$0xff] }
   0x4   :  { %v30_v10 = vsel %vm29_vm0, 0.0, %v25_v1  ;;  %v32_v11 = vsel %vm29_vm0, %v25_v1, 0.0  ;;  %v31_v18 = vsel %vm29_vm0, 0.0, %v26_v5  ;;  %v33_v19 = vsel %vm29_vm0, %v26_v5, 0.0 }
   0x5   :  { %v39_v14 = vrot.slane %v30_v10, 1  ;;  %v40_v15 = vrot.slane %v32_v11, 1  ;;  %v52_v16 = vrot.slane %v30_v10, 2  ;;  %v53_v17 = vrot.slane %v32_v11, 2  ;;  %341 = vmatprep.subr.bf16.mxu0 %v340_v6 }
   0x6   :  { %343 = vmatpush3.bf16.msra.mxu0 %v340_v6  ;;  %v348_v20 = vpack.c.bf16 %v75_v13, %v74_v9 }
   0x7   :  { %10 = vsyncpa [#allocation3], 0  ;;  %v41_v21 = vsel %vm38_vm1, %v39_v14, %v40_v15  ;;  %v54_v22 = vsel %vm51_vm2, %v52_v16, %v53_v17  ;;  %v42_v23 = vrot.slane %v31_v18, 1  ;;  %v43_v24 = vrot.slane %v33_v19, 1  ;;  %345 = vmatprep.subr.bf16.mxu0 %v344_v12  ;;  %s393_s8 = smov 32   ;;  %s394_s9 = smov 64  }
   0x8   :  { %45 = vrot.lane.b32.xlu0 %v41_v21, %s393_s8  ;;  %58 = vrot.lane.b32.xlu1 %v54_v22, %s394_s9  ;;  %v55_v25 = vrot.slane %v31_v18, 2  ;;  %v56_v26 = vrot.slane %v33_v19, 2  ;;  %v76_v27 = vld [vmem:[%s503_s1 + $0x30] sm:$0xff]  ;;  %v77_v28 = vld [vmem:[%s503_s1 + $0x38] sm:$0xff]  ;;  %vm64_vm3 = vcmask 261120   ;;  %vm67_vm4 = vcmask 523264  }
   0x9   :  { %v44_v29 = vsel %vm38_vm1, %v42_v23, %v43_v24  ;;  %v352_v31 = vpack.c.bf16 %v77_v28, %v76_v27  ;;  %v78_v32 = vld [vmem:[%s503_s1 + $0x40] sm:$0xff]  ;;  %v79_v33 = vld [vmem:[%s503_s1 + $0x48] sm:$0xff]  ;;  %v80_v35 = vld [vmem:[%s503_s1 + $0x50] sm:$0xff]  ;;  %vm89_vm5 = vcmask 785408   ;;  %v395_v47 = vmov 0.0   ;;  %s397_s25 = smov [#allocation2]  }
   0xa   :  { %v57_v30 = vsel %vm51_vm2, %v55_v25, %v56_v26  ;;  %347 = vmatpush3.bf16.msra.mxu0 %v344_v12  ;;  %v356_v34 = vpack.c.bf16 %v79_v33, %v78_v32  ;;  %v81_v36 = vld [vmem:[%s503_s1 + $0x58] sm:$0xff]  ;;  %v188_v46 = vld [vmem:[%s505_s3] sm:$0xff]  ;;  %335 = vmatprep.subr.mxu1 %v395_v47  ;;  %vm396_vm6 = vmmov 0   ;;  %vm173_vm7 = vcmask 64512   ;;  %s279_s26 = sshll.u32 %s397_s25, 4  ;;  %s280_s26 = int_to_ptr.vmem [resolvable:$true] %s279_s26 }
   0xb   :  { %349 = vmatprep.subr.bf16.mxu0 %v348_v20  ;;  %v360_v37 = vpack.c.bf16 %v81_v36, %v80_v35  ;;  %337 = vmatprep.mubr.msk.f32.mxu1 %vm396_vm6, %v395_v47  ;;  %v287_v48 = vld [vmem:[%s504_s2] ss:$0 sm:$0xff]  ;;  %vm198_vm8 = vcmask 1041409   ;;  %s369_s27 = scalar_lea.vmem %s280_s26, 32  ;;  %p374_p1 = scmp.lt.s32.totalorder %s280_s26, %s280_s26 }
   0xc   :  { %47 = vrot.lane.b32.xlu0 %v44_v29, %s393_s8  ;;  %60 = vrot.lane.b32.xlu1 %v57_v30, %s394_s9  ;;  %v290_v6 = vld [vmem:[%s506_s4] ss:$0 sm:$0xff]  ;;  %p370_p0 = scmp.ne.s32.totalorder %s280_s26, %s369_s27  ;;  %p375_p2 = scmp.lt.s32.totalorder %s369_s27, %s369_s27 }
   0xd   :  { %336 = vmatpush3.msra.mxu1 %v188_v46 }
   0xe   :  { %351 = vmatpush3.bf16.msra.mxu0 %v348_v20  ;;  %p376_p3 = por %p375_p2, %p374_p1 }
   0xf   :  { %353 = vmatprep.subr.bf16.mxu0 %v352_v31 }
  0x10   :  { %p377_p4 = pnand %p376_p3, %p370_p0 }
  0x12   :  { %355 = vmatpush3.bf16.msra.mxu0 %v352_v31 }
  0x13   :  { %357 = vmatprep.subr.bf16.mxu0 %v356_v34 }
  0x16   :  { %359 = vmatpush3.bf16.msra.mxu0 %v356_v34 }
  0x17   :  { %361 = vmatprep.subr.bf16.mxu0 %v360_v37 }
  0x1a   :  { %363 = vmatpush3.bf16.msra.mxu0 %v360_v37 }
  0x7a   :  { %v46_v38 = vpop.permute.xlu0 %45  ;;  %v59_v39 = vpop.permute.xlu1 %58 }
  0x7b   :  { %v65_v40 = vsel %vm64_vm3, %v30_v10, %v46_v38 }
  0x7c   :  { %v68_v41 = vsel %vm67_vm4, %v65_v40, %v59_v39 }
  0x7d   :  { %332 = vmatprep.mubr.msk.f32.mxu0 %vm89_vm5, %v68_v41 }
  0x7e   :  { %v48_v42 = vpop.permute.xlu0 %47  ;;  %v61_v43 = vpop.permute.xlu1 %60 }
  0x7f   :  { %v66_v44 = vsel %vm64_vm3, %v31_v18, %v48_v42 }
  0x80   :  { %v69_v45 = vsel %vm67_vm4, %v66_v44, %v61_v43 }
  0x81   :  { %333 = vmatmul.mubr.msk.f32.vlgmr.msra.gmra.mrb[0].mxu0 %vm89_vm5, %v69_v45 }
 0x154   :  { %v334_v49 = vpop.f32.mrb[0].mxu0 }
 0x155   :  { %v168_v50 = vadd.f32 %v334_v49, %v287_v48  ;;  %v162_v51 = vpop.f32.mrb[1].mxu0 }
 0x156   :  { %v163_v52 = vadd.f32 %v287_v48, %v162_v51 }
 0x157   :  { %v172_v53 = vmax.f32 %v168_v50, 0.0 }
 0x158   :  { %v171_v54 = vmax.f32 %v163_v52, 0.0 }
 0x159   :  { %v181_v55 = vsel %vm173_vm7, %v172_v53, -inf }
 0x15a   :  { %v182_v56 = vrot.slane %v181_v55, 4  ;;  %v174_v57 = vsel %vm173_vm7, %v171_v54, -inf }
 0x15b   :  { %v175_v58 = vrot.slane %v174_v57, 4 }
 0x15c   :  { %v183_v59 = vmax.f32 %v181_v55, %v182_v56 }
 0x15d   :  { %v176_v60 = vmax.f32 %v174_v57, %v175_v58 }
 0x15e   :  { %v184_v61 = vrot.slane %v183_v59, 2 }
 0x15f   :  { %v177_v62 = vrot.slane %v176_v60, 2 }
 0x160   :  { %v185_v63 = vmax.f32 %v183_v59, %v184_v61 }
 0x161   :  { %v178_v0 = vmax.f32 %v176_v60, %v177_v62 }
 0x162   :  { %v186_v1 = vrot.slane %v185_v63, 1 }
 0x163   :  { %v179_v2 = vrot.slane %v178_v0, 1 }
 0x164   :  { %v187_v3 = vmax.f32 %v185_v63, %v186_v1 }
 0x165   :  { %v180_v4 = vmax.f32 %v178_v0, %v179_v2 }
 0x167   :  { %v199_v5 = vsel %vm198_vm8, %v187_v3, %v180_v4 }
 0x168   :  { %338 = vmatmul.mubr.msk.f32.vlgmr.msra.gmra.mrb[0].mxu1 %vm173_vm7, %v199_v5 }
 0x23b   :  { %v268_v7 = vpop.f32.mrb[0].mxu1 }
 0x23c   :  { %v269_v8 = vadd.f32 %v290_v6, %v268_v7  ;;  %v339_v9 = vpop.f32.mrb[1].mxu1 }
 0x23e   :  { %272 = vst [vmem:[#allocation2] sm:$0x3] %v269_v8 }
 0x23f   :  { %380 = shalt.err (!%p377_p4)
}
 0x240   :  { %s381_s0 = scalar_lea.hbm %s507_s5, 32 }
 0x241   :  { %p382_p5 = scmp.ne.s32.totalorder %s507_s5, %s381_s0  ;;  %p385_p6 = scmp.lt.u32.totalorder %s381_s0, %s507_s5 }
 0x243   :  { %p387_p7 = pnand %p385_p6, %p382_p5 }
 0x245   :  { %390 = shalt.err (!%p387_p7)
}
 0x246   :  { %282 = dma.vmem_to_hbm [thread:$0]  %s280_s26, 32, %s507_s5, [#allocation3]  }
 0x247   :  { %391 = dma.done.wait [#allocation3], 32  }
 0x248   :  { %392 = vsyncadd [#allocation3], 4294967264 }
 0x249   :  { %286 = vsyncpa [#allocation3], 1 }

</bundles_post_ra>
